<compile_context>
chip_gen: v7x
topology: tpu7x:2x2x1
jax: 0.10.0
libtpu: 0.0.40
codegen_flags: <defaults>
</compile_context>

<pallas_src>
import functools
import math

import jax
import jax.numpy as jnp
from jax import lax
from jax.experimental import pallas as pl
from jax.experimental.pallas import tpu as pltpu


def _vmem_budget_bytes():
    """~75% of physical VMEM per TensorCore (48 MiB on v7x, ~96 MiB on v5e/v6e)."""
    cap = 64 * 2**20
    try:
        cap = int(getattr(pltpu.get_tpu_info(), "vmem_capacity_bytes", cap))
    except Exception:
        pass
    return (cap * 3) // 4


def _choose_tile_n(C, E, B, w_item, x_item, budget, requested=None):
    """Lane-aligned class-strip width; multi-MiB strips, sized against the VMEM budget."""
    c_up = ((C + 127) // 128) * 128
    if requested is not None:
        return min(max(128, ((int(requested) + 127) // 128) * 128), c_up)
    strip_target = 4 * 2**20                                   # ~4 MiB W strips
    tn = max(256, (strip_target // max(1, E * w_item)) // 128 * 128)
    # Budget: 2x double-buffered W strip + resident x (x2) + ~6 live (B, tn) f32 temps + slack.
    fixed = 2 * B * E * x_item + (2 << 20)
    per_col = 2 * E * w_item + 6 * B * 4
    tn_max = max(128, ((budget - fixed) // per_col) // 128 * 128)
    return max(128, min(tn, tn_max, c_up))


def _face_ce_kernel(x_ref, w_ref, tgt_ref, m_out, l_out, t_out, *,
                    num_classes, tile_n, tiles_per_shard, need_mask):
    k = pl.program_id(1)

    # Per-shard accumulator init (output blocks stay resident across the class-tile axis).
    @pl.when(k == 0)
    def _():
        m_out[0] = jnp.full(m_out.shape[1:], -jnp.inf, dtype=m_out.dtype)
        l_out[0] = jnp.zeros(l_out.shape[1:], dtype=l_out.dtype)
        t_out[0] = jnp.zeros(t_out.shape[1:], dtype=t_out.dtype)

    # (B, TN) logit strip on the MXU, f32 accumulation.
    s = jnp.dot(x_ref[...], w_ref[...], preferred_element_type=jnp.float32)

    # Global class ids for this strip, built once as (1, TN) and broadcast.
    tile_start = (pl.program_id(0) * tiles_per_shard + k) * tile_n
    cls = tile_start + lax.broadcasted_iota(jnp.int32, (1, tile_n), 1)        # (1, TN)

    if need_mask:
        # Mask columns past C (ragged/overhanging strips).  where(false -> -inf) BEFORE any
        # max/exp, so stale boundary data from the clamped DMA can never propagate.
        s = jnp.where(cls < num_classes, s, -jnp.inf)

    # Online logsumexp update.
    m_prev = m_out[0]                                                          # (B, 1)
    m_new = jnp.maximum(m_prev, jnp.max(s, axis=-1, keepdims=True))
    p_sum = jnp.sum(jnp.exp(s - m_new), axis=-1, keepdims=True)
    l_out[0] = l_out[0] * jnp.exp(m_prev - m_new) + p_sum
    m_out[0] = m_new

    # Target logit: at most one strip matches each row; others contribute 0.
    is_tgt = cls == tgt_ref[...]                                               # (B, TN)
    t_out[0] = t_out[0] + jnp.sum(jnp.where(is_tgt, s, 0.0), axis=-1, keepdims=True)


def face_ce_loss(x, identity_weights, target, *, tile_n=None, num_shards=2,
                 inv_norm=None, vmem_budget_bytes=None):
    """x: (B, E) float, identity_weights: (E, C) float (f32 or bf16), target: (B,) int.

    Returns the scalar f32 cross-entropy loss of x @ normalize(W, dim=1) vs target.
    Pass a precomputed `inv_norm` (shape (E,), f32) so W is streamed from HBM exactly once.
    """
    B, E = x.shape
    E2, C = identity_weights.shape
    assert E == E2, (E, E2)

    w = identity_weights
    w_item = jnp.dtype(w.dtype).itemsize

    if inv_norm is None:
        # F.normalize(W, p=2, dim=1): per-E-row L2 norm over the class axis, eps=1e-12.
        # NOTE: this is a full extra HBM pass over W; in training, carry inv_norm alongside
        # the parameter (or compute it in the optimizer step) and pass it in.
        norm = jnp.sqrt(jnp.sum(jnp.square(w.astype(jnp.float32)), axis=1))    # (E,)
        inv_norm = 1.0 / jnp.maximum(norm, 1e-12)

    # Fold the per-row inverse norm into x: x @ (diag(1/||W[e,:]||) W) == (x * inv_norm) @ W.
    # w_norm is never materialized; W goes from the HBM stream straight into the MXU.
    x_scaled = (x.astype(jnp.float32) * inv_norm[None, :]).astype(w.dtype)
    x_item = jnp.dtype(x_scaled.dtype).itemsize

    budget = int(vmem_budget_bytes) if vmem_budget_bytes is not None else _vmem_budget_bytes()
    tile_n = _choose_tile_n(C, E, B, w_item, x_item, budget, requested=tile_n)

    num_tiles = pl.cdiv(C, tile_n)
    num_shards = max(1, min(int(num_shards), num_tiles))
    tiles_per_shard = pl.cdiv(num_tiles, num_shards)
    # Recompute so every shard's FIRST tile is in-bounds (keeps each shard's running max finite).
    num_shards = pl.cdiv(num_tiles, tiles_per_shard)

    # Masking needed if the last real strip overhangs C, or the last shard has redundant tiles.
    need_mask = (num_tiles * tile_n != C) or (num_shards * tiles_per_shard != num_tiles)

    target2d = target.astype(jnp.int32).reshape(B, 1)

    kernel = functools.partial(_face_ce_kernel, num_classes=C, tile_n=tile_n,
                               tiles_per_shard=tiles_per_shard, need_mask=need_mask)

    def w_index(s, k):
        # Clamp so redundant trailing tiles of the last shard never request an OOB block;
        # their logits are fully -inf-masked in the kernel anyway.
        return (0, jnp.minimum(s * tiles_per_shard + k, num_tiles - 1))

    acc_shape = jax.ShapeDtypeStruct((num_shards, B, 1), jnp.float32)
    acc_spec = pl.BlockSpec((1, B, 1), lambda s, k: (s, 0, 0))

    cost = pl.CostEstimate(
        flops=2 * B * E * num_shards * tiles_per_shard * tile_n,
        transcendentals=B * num_shards * tiles_per_shard * tile_n,
        bytes_accessed=E * C * w_item + B * E * x_item + B * 4 + 3 * num_shards * B * 4,
    )

    m_p, l_p, t_p = pl.pallas_call(
        kernel,
        out_shape=(acc_shape, acc_shape, acc_shape),
        grid_spec=pltpu.PrefetchScalarGridSpec(
            num_scalar_prefetch=0,
            grid=(num_shards, tiles_per_shard),
            in_specs=[
                pl.BlockSpec((B, E), lambda s, k: (0, 0)),        # x: VMEM-resident
                pl.BlockSpec((E, tile_n), w_index),               # W: streamed class strips
                pl.BlockSpec((B, 1), lambda s, k: (0, 0)),        # targets: resident
            ],
            out_specs=(acc_spec, acc_spec, acc_spec),             # per-shard (m, l, tgt) partials
        ),
        compiler_params=pltpu.CompilerParams(
            dimension_semantics=("parallel", "arbitrary"),        # shards fill v7x's 2nd TC
            vmem_limit_bytes=budget,
        ),
        cost_estimate=cost,
    )(x_scaled, w, target2d)

    # Cheap (num_shards x B) logsumexp-merge of the per-shard partials.
    m = jnp.max(m_p, axis=0)                                      # (B, 1)
    l = jnp.sum(l_p * jnp.exp(m_p - m[None]), axis=0)             # (B, 1)
    t = jnp.sum(t_p, axis=0)                                      # (B, 1)
    return jnp.mean((m + jnp.log(l)) - t)


def init_identity_weights(key, embedding_channels, training_classes):
    # nn.init.xavier_uniform_ on an (E, C) tensor: fan_in = C, fan_out = E, gain = 1.
    fan_in, fan_out = training_classes, embedding_channels
    bound = math.sqrt(6.0 / (fan_in + fan_out))
    return jax.random.uniform(
        key, (embedding_channels, training_classes),
        minval=-bound, maxval=bound, dtype=jnp.float32)


if __name__ == "__main__":
    # Small shapes consistent with the module; C deliberately NOT a multiple of 128 so the
    # ragged (clamped + masked) last class strip and the shard merge are exercised.
    B, E, C = 16, 64, 1000
    key = jax.random.PRNGKey(0)
    kx, kw, kt = jax.random.split(key, 3)

    x = jax.random.normal(kx, (B, E), dtype=jnp.float32)
    identity_weights = init_identity_weights(kw, E, C)
    target = jax.random.randint(kt, (B,), 0, C, dtype=jnp.int32)

    # Pure-JAX reference (same math as the PyTorch module).
    w_norm = identity_weights / jnp.maximum(
        jnp.linalg.norm(identity_weights, axis=1, keepdims=True), 1e-12)
    logits = x @ w_norm
    ref = jnp.mean(jax.nn.logsumexp(logits, axis=-1) -
                   jnp.take_along_axis(logits, target[:, None], axis=1)[:, 0])

    # 1) Auto tile width (single strip covers C here), norm computed in-wrapper.
    loss = face_ce_loss(x, identity_weights, target)
    jax.block_until_ready(loss)
    assert jnp.allclose(loss, ref, rtol=1e-4, atol=1e-4), (loss, ref)

    # Precompute inv_norm once (training-style caching -> one HBM pass over W per loss call).
    inv_norm = 1.0 / jnp.maximum(
        jnp.sqrt(jnp.sum(jnp.square(identity_weights), axis=1)), 1e-12)

    # 2) Small strips + 2 class shards: ragged last strip + parallel shard merge.
    loss2 = face_ce_loss(x, identity_weights, target, tile_n=256, num_shards=2,
                         inv_norm=inv_norm)
    jax.block_until_ready(loss2)
    assert jnp.allclose(loss2, ref, rtol=1e-4, atol=1e-4), (loss2, ref)

    # 3) 3 shards over 8 strips: last shard carries a fully out-of-range (fully masked) strip.
    loss3 = face_ce_loss(x, identity_weights, target, tile_n=128, num_shards=3,
                         inv_norm=inv_norm)
    jax.block_until_ready(loss3)
    assert jnp.allclose(loss3, ref, rtol=1e-4, atol=1e-4), (loss3, ref)

    # 4) Weights stored persistently in bf16 (half-width HBM stream, no in-wrapper cast);
    #    softmax math stays f32 in-kernel.
    w_bf16 = identity_weights.astype(jnp.bfloat16)
    loss_bf16 = face_ce_loss(x, w_bf16, target, tile_n=256, num_shards=2, inv_norm=inv_norm)
    jax.block_until_ready(loss_bf16)
    assert jnp.abs(loss_bf16 - ref) < 0.1, (loss_bf16, ref)

    print("KERNEL_OK")
</pallas_src>

<mosaic_0001>
module attributes {stable_mosaic.version = 11 : i64} {
  func.func @_face_ce_kernel(%arg0: i32, %arg1: i32, %arg2: memref<16x64xf32, #tpu.memory_space<vmem>>, %arg3: memref<64x1024xf32, #tpu.memory_space<vmem>>, %arg4: memref<16x1xi32, #tpu.memory_space<vmem>>, %arg5: memref<1x16x1xf32, #tpu.memory_space<vmem>>, %arg6: memref<1x16x1xf32, #tpu.memory_space<vmem>>, %arg7: memref<1x16x1xf32, #tpu.memory_space<vmem>>) attributes {dimension_semantics = [#tpu.dimension_semantics<parallel>, #tpu.dimension_semantics<arbitrary>], iteration_bounds = array<i64: 1, 1>, scalar_prefetch = 0 : i64, scratch_operands = 0 : i64, tpu.core_type = #tpu.core_type<tc>, window_params = [{pipeline_mode = #tpu.pipeline_mode<synchronous>, transform_indices = @transform_0, window_bounds = array<i64: 16, 64>}, {transform_indices = @transform_1, window_bounds = array<i64: 64, 1024>}, {pipeline_mode = #tpu.pipeline_mode<synchronous>, transform_indices = @transform_2, window_bounds = array<i64: 16, 1>}, {transform_indices = @transform_3, window_bounds = array<i64: 1, 16, 1>}, {transform_indices = @transform_4, window_bounds = array<i64: 1, 16, 1>}, {transform_indices = @transform_5, window_bounds = array<i64: 1, 16, 1>}]} {
    %c0_i32 = arith.constant 0 : i32
    %0 = arith.cmpi eq, %arg1, %c0_i32 : i32
    %1 = arith.extui %0 : i1 to i32
    %c0_i32_0 = arith.constant 0 : i32
    %2 = arith.cmpi ne, %1, %c0_i32_0 : i32
    scf.if %2 {
      %cst_29 = arith.constant 0xFF800000 : f32
      %54 = vector.broadcast %cst_29 : f32 to vector<16x1xf32>
      %c0_30 = arith.constant 0 : index
      %c0_31 = arith.constant 0 : index
      %c0_32 = arith.constant 0 : index
      %55 = vector.load %arg5[%c0_30, %c0_31, %c0_32] : memref<1x16x1xf32, #tpu.memory_space<vmem>>, vector<1x16x1xf32>
      %56 = vector.shape_cast %55 : vector<1x16x1xf32> to vector<16x1xf32>
      %57 = vector.shape_cast %54 : vector<16x1xf32> to vector<1x16x1xf32>
      tpu.vector_store %arg5[%c0_30, %c0_31, %c0_32], %57 {strides = array<i32>} : memref<1x16x1xf32, #tpu.memory_space<vmem>>, vector<1x16x1xf32>,
      %cst_33 = arith.constant 0.000000e+00 : f32
      %58 = vector.broadcast %cst_33 : f32 to vector<16x1xf32>
      %c0_34 = arith.constant 0 : index
      %c0_35 = arith.constant 0 : index
      %c0_36 = arith.constant 0 : index
      %59 = vector.load %arg6[%c0_34, %c0_35, %c0_36] : memref<1x16x1xf32, #tpu.memory_space<vmem>>, vector<1x16x1xf32>
      %60 = vector.shape_cast %59 : vector<1x16x1xf32> to vector<16x1xf32>
      %61 = vector.shape_cast %58 : vector<16x1xf32> to vector<1x16x1xf32>
      tpu.vector_store %arg6[%c0_34, %c0_35, %c0_36], %61 {strides = array<i32>} : memref<1x16x1xf32, #tpu.memory_space<vmem>>, vector<1x16x1xf32>,
      %cst_37 = arith.constant 0.000000e+00 : f32
      %62 = vector.broadcast %cst_37 : f32 to vector<16x1xf32>
      %c0_38 = arith.constant 0 : index
      %c0_39 = arith.constant 0 : index
      %c0_40 = arith.constant 0 : index
      %63 = vector.load %arg7[%c0_38, %c0_39, %c0_40] : memref<1x16x1xf32, #tpu.memory_space<vmem>>, vector<1x16x1xf32>
      %64 = vector.shape_cast %63 : vector<1x16x1xf32> to vector<16x1xf32>
      %65 = vector.shape_cast %62 : vector<16x1xf32> to vector<1x16x1xf32>
      tpu.vector_store %arg7[%c0_38, %c0_39, %c0_40], %65 {strides = array<i32>} : memref<1x16x1xf32, #tpu.memory_space<vmem>>, vector<1x16x1xf32>,
    } else {
    }
    %c0 = arith.constant 0 : index
    %c0_1 = arith.constant 0 : index
    %3 = vector.load %arg2[%c0, %c0_1] : memref<16x64xf32, #tpu.memory_space<vmem>>, vector<16x64xf32>
    %c0_2 = arith.constant 0 : index
    %c0_3 = arith.constant 0 : index
    %4 = vector.load %arg3[%c0_2, %c0_3] : memref<64x1024xf32, #tpu.memory_space<vmem>>, vector<64x1024xf32>
    %cst = arith.constant dense<0.000000e+00> : vector<16x1024xf32>
    %5 = tpu.matmul %3, %4, %cst {dimension_numbers = #tpu.dot_dimension_numbers<[1], [0], [0], [1], [0, 0, 1, 1], [], []>} : vector<16x64xf32>, vector<64x1024xf32>, vector<16x1024xf32> -> vector<16x1024xf32>
    %c1_i32 = arith.constant 1 : i32
    %6 = arith.muli %arg0, %c1_i32 : i32
    %7 = arith.addi %6, %arg1 : i32
    %c1024_i32 = arith.constant 1024 : i32
    %8 = arith.muli %7, %c1024_i32 : i32
    %9 = tpu.iota {dimensions = array<i32: 1>} : vector<1x1024xi32>
    %10 = vector.broadcast %8 : i32 to vector<1x1024xi32>
    %11 = arith.addi %10, %9 : vector<1x1024xi32>
    %c1000_i32 = arith.constant 1000 : i32
    %12 = vector.broadcast %c1000_i32 : i32 to vector<1x1024xi32>
    %13 = arith.cmpi slt, %11, %12 : vector<1x1024xi32>
    %cst_4 = arith.constant 0xFF800000 : f32
    %14 = vector.shape_cast %13 : vector<1x1024xi1> to vector<1x1024xi1>
    %15 = vector.broadcast %14 : vector<1x1024xi1> to vector<16x1024xi1>
    %16 = vector.broadcast %cst_4 : f32 to vector<16x1024xf32>
    %17 = arith.select %15, %5, %16 : vector<16x1024xi1>, vector<16x1024xf32>
    %c0_5 = arith.constant 0 : index
    %c0_6 = arith.constant 0 : index
    %c0_7 = arith.constant 0 : index
    %18 = vector.load %arg5[%c0_5, %c0_6, %c0_7] : memref<1x16x1xf32, #tpu.memory_space<vmem>>, vector<1x16x1xf32>
    %19 = vector.shape_cast %18 : vector<1x16x1xf32> to vector<16x1xf32>
    %cst_8 = arith.constant dense<0xFF800000> : vector<16xf32>
    %20 = vector.multi_reduction <maximumf>, %17, %cst_8 [1] : vector<16x1024xf32> to vector<16xf32>
    %21 = vector.shape_cast %20 : vector<16xf32> to vector<16x1xf32>
    %22 = arith.maximumf %19, %21 : vector<16x1xf32>
    %23 = vector.broadcast %22 : vector<16x1xf32> to vector<16x1024xf32>
    %24 = arith.subf %17, %23 : vector<16x1024xf32>
    %25 = math.exp %24 : vector<16x1024xf32>
    %cst_9 = arith.constant dense<0.000000e+00> : vector<16xf32>
    %26 = vector.multi_reduction <add>, %25, %cst_9 [1] : vector<16x1024xf32> to vector<16xf32>
    %27 = vector.shape_cast %26 : vector<16xf32> to vector<16x1xf32>
    %c0_10 = arith.constant 0 : index
    %c0_11 = arith.constant 0 : index
    %c0_12 = arith.constant 0 : index
    %28 = vector.load %arg6[%c0_10, %c0_11, %c0_12] : memref<1x16x1xf32, #tpu.memory_space<vmem>>, vector<1x16x1xf32>
    %29 = vector.shape_cast %28 : vector<1x16x1xf32> to vector<16x1xf32>
    %30 = arith.subf %19, %22 : vector<16x1xf32>
    %31 = math.exp %30 : vector<16x1xf32>
    %32 = arith.mulf %29, %31 : vector<16x1xf32>
    %33 = arith.addf %32, %27 : vector<16x1xf32>
    %c0_13 = arith.constant 0 : index
    %c0_14 = arith.constant 0 : index
    %c0_15 = arith.constant 0 : index
    %34 = vector.load %arg6[%c0_13, %c0_14, %c0_15] : memref<1x16x1xf32, #tpu.memory_space<vmem>>, vector<1x16x1xf32>
    %35 = vector.shape_cast %34 : vector<1x16x1xf32> to vector<16x1xf32>
    %36 = vector.shape_cast %33 : vector<16x1xf32> to vector<1x16x1xf32>
    tpu.vector_store %arg6[%c0_13, %c0_14, %c0_15], %36 {strides = array<i32>} : memref<1x16x1xf32, #tpu.memory_space<vmem>>, vector<1x16x1xf32>,
    %c0_16 = arith.constant 0 : index
    %c0_17 = arith.constant 0 : index
    %c0_18 = arith.constant 0 : index
    %37 = vector.load %arg5[%c0_16, %c0_17, %c0_18] : memref<1x16x1xf32, #tpu.memory_space<vmem>>, vector<1x16x1xf32>
    %38 = vector.shape_cast %37 : vector<1x16x1xf32> to vector<16x1xf32>
    %39 = vector.shape_cast %22 : vector<16x1xf32> to vector<1x16x1xf32>
    tpu.vector_store %arg5[%c0_16, %c0_17, %c0_18], %39 {strides = array<i32>} : memref<1x16x1xf32, #tpu.memory_space<vmem>>, vector<1x16x1xf32>,
    %c0_19 = arith.constant 0 : index
    %c0_20 = arith.constant 0 : index
    %40 = vector.load %arg4[%c0_19, %c0_20] : memref<16x1xi32, #tpu.memory_space<vmem>>, vector<16x1xi32>
    %41 = vector.broadcast %11 : vector<1x1024xi32> to vector<16x1024xi32>
    %42 = vector.broadcast %40 : vector<16x1xi32> to vector<16x1024xi32>
    %43 = arith.cmpi eq, %41, %42 : vector<16x1024xi32>
    %c0_21 = arith.constant 0 : index
    %c0_22 = arith.constant 0 : index
    %c0_23 = arith.constant 0 : index
    %44 = vector.load %arg7[%c0_21, %c0_22, %c0_23] : memref<1x16x1xf32, #tpu.memory_space<vmem>>, vector<1x16x1xf32>
    %45 = vector.shape_cast %44 : vector<1x16x1xf32> to vector<16x1xf32>
    %cst_24 = arith.constant 0.000000e+00 : f32
    %46 = vector.broadcast %cst_24 : f32 to vector<16x1024xf32>
    %47 = arith.select %43, %17, %46 : vector<16x1024xi1>, vector<16x1024xf32>
    %cst_25 = arith.constant dense<0.000000e+00> : vector<16xf32>
    %48 = vector.multi_reduction <add>, %47, %cst_25 [1] : vector<16x1024xf32> to vector<16xf32>
    %49 = vector.shape_cast %48 : vector<16xf32> to vector<16x1xf32>
    %50 = arith.addf %45, %49 : vector<16x1xf32>
    %c0_26 = arith.constant 0 : index
    %c0_27 = arith.constant 0 : index
    %c0_28 = arith.constant 0 : index
    %51 = vector.load %arg7[%c0_26, %c0_27, %c0_28] : memref<1x16x1xf32, #tpu.memory_space<vmem>>, vector<1x16x1xf32>
    %52 = vector.shape_cast %51 : vector<1x16x1xf32> to vector<16x1xf32>
    %53 = vector.shape_cast %50 : vector<16x1xf32> to vector<1x16x1xf32>
    tpu.vector_store %arg7[%c0_26, %c0_27, %c0_28], %53 {strides = array<i32>} : memref<1x16x1xf32, #tpu.memory_space<vmem>>, vector<1x16x1xf32>,
    return
  }
  func.func @transform_0(%arg0: i32, %arg1: i32) -> (i32, i32) {
    %c0_i32 = arith.constant 0 : i32
    %c0_i32_0 = arith.constant 0 : i32
    %c0_i32_1 = arith.constant 0 : i32
    return %c0_i32, %c0_i32_0 : i32, i32
  }
  func.func @transform_1(%arg0: i32, %arg1: i32) -> (i32, i32) {
    %c1_i32 = arith.constant 1 : i32
    %0 = arith.muli %arg0, %c1_i32 : i32
    %1 = arith.addi %0, %arg1 : i32
    %c0_i32 = arith.constant 0 : i32
    %2 = arith.minsi %1, %c0_i32 : i32
    %c0_i32_0 = arith.constant 0 : i32
    %c0_i32_1 = arith.constant 0 : i32
    return %c0_i32_0, %2 : i32, i32
  }
  func.func @transform_2(%arg0: i32, %arg1: i32) -> (i32, i32) {
    %c0_i32 = arith.constant 0 : i32
    %c0_i32_0 = arith.constant 0 : i32
    %c0_i32_1 = arith.constant 0 : i32
    return %c0_i32, %c0_i32_0 : i32, i32
  }
  func.func @transform_3(%arg0: i32, %arg1: i32) -> (i32, i32, i32) {
    %c0_i32 = arith.constant 0 : i32
    %c0_i32_0 = arith.constant 0 : i32
    %c0_i32_1 = arith.constant 0 : i32
    return %arg0, %c0_i32, %c0_i32_0 : i32, i32, i32
  }
  func.func @transform_4(%arg0: i32, %arg1: i32) -> (i32, i32, i32) {
    %c0_i32 = arith.constant 0 : i32
    %c0_i32_0 = arith.constant 0 : i32
    %c0_i32_1 = arith.constant 0 : i32
    return %arg0, %c0_i32, %c0_i32_0 : i32, i32, i32
  }
  func.func @transform_5(%arg0: i32, %arg1: i32) -> (i32, i32, i32) {
    %c0_i32 = arith.constant 0 : i32
    %c0_i32_0 = arith.constant 0 : i32
    %c0_i32_1 = arith.constant 0 : i32
    return %arg0, %c0_i32, %c0_i32_0 : i32, i32, i32
  }
}

</mosaic_0001>

<bundles_post_ra>
// kernel: tpu_custom_call.1
= control target key start
LH: loop header
LB: loop body
LE: loop exit
PB: predicated region body
PF: predicated region fallthrough
CT: control target
= control target key end

     0   :  { %11 = vsyncpa [#allocation3], 0  ;;  %s827_s18 = smov [#allocation2]   ;;  %s1137_s0 = inlined_call_operand.vmem [shape: f32[16,64], index: 0, kind: input, shape index: {}]   ;;  %s1138_s1 = inlined_call_operand.hbm [shape: f32[64,1000], index: 1, kind: input, shape index: {}]   ;;  %s1139_s2 = inlined_call_operand.vmem [shape: s32[16,1], index: 2, kind: input, shape index: {}]   ;;  %s1140_s3 = inlined_call_operand.vmem [shape: f32[1,16,1], index: 3, kind: output, shape index: {0}]   ;;  %s1141_s4 = inlined_call_operand.vmem [shape: f32[1,16,1], index: 4, kind: output, shape index: {1}]   ;;  %s1142_s5 = inlined_call_operand.vmem [shape: f32[1,16,1], index: 5, kind: output, shape index: {2}]  }
   0x1   :  { %s25_s19 = sshll.u32 %s827_s18, 4  ;;  %s803_s22 = scalar_lea.hbm %s1138_s1, 8192  ;;  %s26_s19 = int_to_ptr.vmem [resolvable:$true] %s25_s19 }
   0x2   :  { %p804_p0 = scmp.ne.s32.totalorder %s1138_s1, %s803_s22  ;;  %p807_p1 = scmp.lt.u32.totalorder %s803_s22, %s1138_s1 }
   0x4   :  { %p809_p2 = pnand %p807_p1, %p804_p0 }
   0x6   :  { %812 = shalt.err (!%p809_p2)
}
   0x7   :  { %s813_s27 = scalar_lea.vmem %s26_s19, 8192  ;;  %p818_p4 = scmp.lt.s32.totalorder %s26_s19, %s26_s19 }
   0x8   :  { %p814_p3 = scmp.ne.s32.totalorder %s26_s19, %s813_s27  ;;  %p819_p5 = scmp.lt.s32.totalorder %s813_s27, %s813_s27 }
   0xa   :  { %p820_p6 = por %p819_p5, %p818_p4 }
   0xc   :  { %p821_p7 = pnand %p820_p6, %p814_p3 }
   0xe   :  { %824 = shalt.err (!%p821_p7)
}
   0xf   :  { %s828_s28 = smov 1024   ;;  %s829_s29 = smov 64  }
  0x10   :  { %31 = dma.hbm_to_vmem [thread:$0]  %s1138_s1, 8192, %s26_s19, [#allocation3], %s828_s28, %s828_s28, %s829_s29  }
  0x11   :  { %825 = dma.done.wait [#allocation3], 8192  }
  0x12   :  { %826 = vsyncadd [#allocation3], 4294959104  ;;  %v830_v0 = vmov 0.0   ;;  %v55_v1 = vld [vmem:[#allocation2 + $0x8] sm:$0xff]  ;;  %v57_v3 = vld [vmem:[#allocation2 + $0x18] sm:$0xff]  ;;  %vm118_vm0 = vcmask 523264  }
  0x13   :  { %189 = vmatprep.mubr.f32.mxu0 %v830_v0  ;;  %266 = vmatprep.mubr.f32.mxu1 %v830_v0  ;;  %v63_v2 = vld [vmem:[#allocation2 + $0x48] sm:$0xff]  ;;  %v65_v5 = vld [vmem:[#allocation2 + $0x58] sm:$0xff]  ;;  %v54_v6 = vld [vmem:[#allocation2] sm:$0xff]  ;;  %vm45_vm1 = vcmask 7168  }
  0x14   :  { %v695_v4 = vpack.c.bf16 %v63_v2, %v55_v1  ;;  %v62_v7 = vld [vmem:[#allocation2 + $0x40] sm:$0xff]  ;;  %v711_v8 = vpack.c.bf16 %v65_v5, %v57_v3  ;;  %v56_v10 = vld [vmem:[#allocation2 + $0x10] sm:$0xff]  ;;  %v71_v12 = vld [vmem:[#allocation2 + $0x88] sm:$0xff]  ;;  %48 = vst.msk [vmem:[%s1141_s4] sm:$0xff] %vm45_vm1, %v830_v0 }
  0x15   :  { %v697_v9 = vpack.c.bf16 %v62_v7, %v54_v6  ;;  %v64_v11 = vld [vmem:[#allocation2 + $0x50] sm:$0xff]  ;;  %v79_v14 = vld [vmem:[#allocation2 + $0xc8] sm:$0xff]  ;;  %v73_v15 = vld [vmem:[#allocation2 + $0x98] sm:$0xff]  ;;  %49 = vst.msk [vmem:[%s1141_s4 + $0x8] sm:$0xff] %vm45_vm1, %v830_v0 }
  0x16   :  { %696 = vmatprep.subr.bf16.mxu0 %v695_v4  ;;  %v713_v13 = vpack.c.bf16 %v64_v11, %v56_v10  ;;  %v81_v16 = vld [vmem:[#allocation2 + $0xd8] sm:$0xff]  ;;  %712 = vmatprep.subr.bf16.mxu1 %v711_v8  ;;  %v699_v17 = vpack.c.bf16 %v79_v14, %v71_v12  ;;  %v70_v19 = vld [vmem:[#allocation2 + $0x80] sm:$0xff]  ;;  %v72_v21 = vld [vmem:[#allocation2 + $0x90] sm:$0xff]  ;;  %50 = vst.msk [vmem:[%s1142_s5] sm:$0xff] %vm45_vm1, %v830_v0 }
  0x17   :  { %698 = vmatpush1.bf16.msra.mxu0 %v697_v9  ;;  %v715_v18 = vpack.c.bf16 %v81_v16, %v73_v15  ;;  %v78_v20 = vld [vmem:[#allocation2 + $0xc0] sm:$0xff]  ;;  %v80_v23 = vld [vmem:[#allocation2 + $0xd0] sm:$0xff]  ;;  %v87_v24 = vld [vmem:[#allocation2 + $0x108] sm:$0xff]  ;;  %51 = vst.msk [vmem:[%s1142_s5 + $0x8] sm:$0xff] %vm45_vm1, %v830_v0 }
  0x18   :  { %714 = vmatpush1.bf16.msra.mxu1 %v713_v13  ;;  %v701_v22 = vpack.c.bf16 %v78_v20, %v70_v19  ;;  %v95_v25 = vld [vmem:[#allocation2 + $0x148] sm:$0xff]  ;;  %700 = vmatprep.subr.bf16.mxu0 %v699_v17  ;;  %v717_v26 = vpack.c.bf16 %v80_v23, %v72_v21  ;;  %v89_v28 = vld [vmem:[#allocation2 + $0x118] sm:$0xff]  ;;  %v86_v30 = vld [vmem:[#allocation2 + $0x100] sm:$0xff] }
  0x19   :  { %716 = vmatprep.subr.bf16.mxu1 %v715_v18  ;;  %v703_v27 = vpack.c.bf16 %v95_v25, %v87_v24  ;;  %v97_v29 = vld [vmem:[#allocation2 + $0x158] sm:$0xff]  ;;  %v94_v32 = vld [vmem:[#allocation2 + $0x140] sm:$0xff]  ;;  %v88_v33 = vld [vmem:[#allocation2 + $0x110] sm:$0xff] }
  0x1a   :  { %v719_v31 = vpack.c.bf16 %v97_v29, %v89_v28  ;;  %v96_v34 = vld [vmem:[#allocation2 + $0x150] sm:$0xff]  ;;  %v705_v35 = vpack.c.bf16 %v94_v32, %v86_v30  ;;  %v103_v36 = vld [vmem:[#allocation2 + $0x188] sm:$0xff]  ;;  %v105_v38 = vld [vmem:[#allocation2 + $0x198] sm:$0xff] }
  0x1b   :  { %702 = vmatpush1.bf16.msra.mxu0 %v701_v22  ;;  %v111_v37 = vld [vmem:[#allocation2 + $0x1c8] sm:$0xff]  ;;  %v721_v39 = vpack.c.bf16 %v96_v34, %v88_v33  ;;  %v113_v41 = vld [vmem:[#allocation2 + $0x1d8] sm:$0xff]  ;;  %v102_v42 = vld [vmem:[#allocation2 + $0x180] sm:$0xff] }
  0x1c   :  { %718 = vmatpush1.bf16.msra.mxu1 %v717_v26  ;;  %704 = vmatprep.subr.bf16.mxu0 %v703_v27  ;;  %v707_v40 = vpack.c.bf16 %v111_v37, %v103_v36  ;;  %v110_v43 = vld [vmem:[#allocation2 + $0x1c0] sm:$0xff]  ;;  %v723_v44 = vpack.c.bf16 %v113_v41, %v105_v38  ;;  %v104_v45 = vld [vmem:[#allocation2 + $0x190] sm:$0xff]  ;;  %v59_v47 = vld [vmem:[#allocation2 + $0x28] sm:$0xff]  ;;  %v831_v36 = vmov 0   ;;  %v832_v37 = vmov -inf  }
  0x1d   :  { %720 = vmatprep.subr.bf16.mxu1 %v719_v31  ;;  %v112_v46 = vld [vmem:[#allocation2 + $0x1d0] sm:$0xff]  ;;  %v67_v48 = vld [vmem:[#allocation2 + $0x68] sm:$0xff]  ;;  %v61_v49 = vld [vmem:[#allocation2 + $0x38] sm:$0xff]  ;;  %v709_v50 = vpack.c.bf16 %v110_v43, %v102_v42  ;;  %766 = vset.pattern.permute.xlu0 %v831_v36  ;;  %46 = vst.msk [vmem:[%s1140_s3] sm:$0xff] %vm45_vm1, %v832_v37 }
  0x1e   :  { %v69_v51 = vld [vmem:[#allocation2 + $0x78] sm:$0xff]  ;;  %v725_v52 = vpack.c.bf16 %v112_v46, %v104_v45  ;;  %v727_v53 = vpack.c.bf16 %v67_v48, %v59_v47  ;;  %v58_v54 = vld [vmem:[#allocation2 + $0x20] sm:$0xff]  ;;  %v60_v56 = vld [vmem:[#allocation2 + $0x30] sm:$0xff]  ;;  %765 = vset.pattern.permute.xlu1 %v831_v36  ;;  %47 = vst.msk [vmem:[%s1140_s3 + $0x8] sm:$0xff] %vm45_vm1, %v832_v37  ;;  %v435_v45 = vlaneseq }
  0x1f   :  { %706 = vmatpush1.bf16.msra.mxu0 %v705_v35  ;;  %v66_v55 = vld [vmem:[#allocation2 + $0x60] sm:$0xff]  ;;  %v743_v57 = vpack.c.bf16 %v69_v51, %v61_v49  ;;  %v68_v58 = vld [vmem:[#allocation2 + $0x70] sm:$0xff]  ;;  %v75_v59 = vld [vmem:[#allocation2 + $0xa8] sm:$0xff] }
  0x20   :  { %722 = vmatpush1.bf16.msra.mxu1 %v721_v39  ;;  %708 = vmatprep.subr.bf16.mxu0 %v707_v40  ;;  %v83_v60 = vld [vmem:[#allocation2 + $0xe8] sm:$0xff]  ;;  %v77_v61 = vld [vmem:[#allocation2 + $0xb8] sm:$0xff]  ;;  %v880_v63 = vld [vmem:[%s1137_s0] sm:$0xff]  ;;  %v729_v1 = vpack.c.bf16 %v66_v55, %v58_v54  ;;  %v745_v2 = vpack.c.bf16 %v68_v58, %v60_v56 }
  0x21   :  { %724 = vmatprep.subr.bf16.mxu1 %v723_v44  ;;  %v85_v62 = vld [vmem:[#allocation2 + $0xf8] sm:$0xff]  ;;  %v731_v3 = vpack.c.bf16 %v83_v60, %v75_v59  ;;  %v74_v4 = vld [vmem:[#allocation2 + $0xa0] sm:$0xff]  ;;  %v76_v6 = vld [vmem:[#allocation2 + $0xb0] sm:$0xff] }
  0x22   :  { %v82_v5 = vld [vmem:[#allocation2 + $0xe0] sm:$0xff]  ;;  %v747_v7 = vpack.c.bf16 %v85_v62, %v77_v61  ;;  %v84_v8 = vld [vmem:[#allocation2 + $0xf0] sm:$0xff]  ;;  %v91_v9 = vld [vmem:[#allocation2 + $0x128] sm:$0xff] }
  0x23   :  { %710 = vmatpush1.bf16.msra.mxu0 %v709_v50  ;;  %v99_v10 = vld [vmem:[#allocation2 + $0x168] sm:$0xff]  ;;  %v93_v11 = vld [vmem:[#allocation2 + $0x138] sm:$0xff]  ;;  %v733_v13 = vpack.c.bf16 %v82_v5, %v74_v4  ;;  %v749_v15 = vpack.c.bf16 %v84_v8, %v76_v6  ;;  %v90_v17 = vld [vmem:[#allocation2 + $0x120] sm:$0xff]  ;;  %v955_v50 = vand.u32 127, %v435_v45 }
  0x24   :  { %726 = vmatpush1.bf16.msra.mxu1 %v725_v52  ;;  %728 = vmatprep.subr.bf16.mxu0 %v727_v53  ;;  %v101_v12 = vld [vmem:[#allocation2 + $0x178] sm:$0xff]  ;;  %v53_v14 = vld [vmem:[%s1137_s0 + $0x8] sm:$0xff]  ;;  %v735_v16 = vpack.c.bf16 %v99_v10, %v91_v9  ;;  %v98_v18 = vld [vmem:[#allocation2 + $0x160] sm:$0xff] }
  0x25   :  { %744 = vmatprep.subr.bf16.mxu1 %v743_v57  ;;  %v92_v19 = vld [vmem:[#allocation2 + $0x130] sm:$0xff]  ;;  %v751_v20 = vpack.c.bf16 %v101_v12, %v93_v11  ;;  %v107_v22 = vld [vmem:[#allocation2 + $0x1a8] sm:$0xff]  ;;  %v109_v24 = vld [vmem:[#allocation2 + $0x1b8] sm:$0xff]  ;;  %v737_v26 = vpack.c.bf16 %v98_v18, %v90_v17  ;;  %v958_v51 = vadd.s32 896, %v955_v50 }
  0x26   :  { %687 = vmatmul.mubr.msk.f32.vlgmr.msra.gmra.mrb[0].mxu0 %vm118_vm0, %v880_v63  ;;  %v100_v21 = vld [vmem:[#allocation2 + $0x170] sm:$0xff]  ;;  %v115_v23 = vld [vmem:[#allocation2 + $0x1e8] sm:$0xff]  ;;  %v117_v25 = vld [vmem:[#allocation2 + $0x1f8] sm:$0xff] }
  0x27   :  { %689 = vmatmul.mubr.msk.f32.vlgmr.msra.gmra.mrb[0].mxu1 %vm118_vm0, %v880_v63  ;;  %730 = vmatpush1.bf16.msra.mxu0 %v729_v1  ;;  %v753_v27 = vpack.c.bf16 %v100_v21, %v92_v19  ;;  %v739_v28 = vpack.c.bf16 %v115_v23, %v107_v22  ;;  %v106_v29 = vld [vmem:[#allocation2 + $0x1a0] sm:$0xff]  ;;  %v755_v31 = vpack.c.bf16 %v117_v25, %v109_v24  ;;  %v108_v32 = vld [vmem:[#allocation2 + $0x1b0] sm:$0xff]  ;;  %vm460_vm2 = vcmp.lt.s32.totalorder %v958_v51, 1000  ;;  %v609_v18 = vld [vmem:[%s1139_s2 + $0x8] sm:$0xff] }
  0x28   :  { %746 = vmatpush1.bf16.msra.mxu1 %v745_v2  ;;  %732 = vmatprep.subr.bf16.mxu0 %v731_v3  ;;  %v114_v30 = vld [vmem:[#allocation2 + $0x1e0] sm:$0xff]  ;;  %v116_v33 = vld [vmem:[#allocation2 + $0x1f0] sm:$0xff]  ;;  %v1028_v19 = vadd.s32 128, %v955_v50  ;;  %v1034_v22 = vadd.s32 384, %v955_v50  ;;  %v1039_v23 = vadd.s32 512, %v955_v50 }
  0x29   :  { %748 = vmatprep.subr.bf16.mxu1 %v747_v7  ;;  %195 = vmatprep.mubr.f32.mxu0 %v830_v0  ;;  %v741_v34 = vpack.c.bf16 %v114_v30, %v106_v29  ;;  %v757_v35 = vpack.c.bf16 %v116_v33, %v108_v32  ;;  %v608_v9 = vld [vmem:[%s1139_s2] sm:$0xff]  ;;  %v1050_v29 = vadd.s32 768, %v955_v50 }
  0x2a   :  { %272 = vmatprep.mubr.f32.mxu1 %v830_v0  ;;  %688 = vmatmul.mubr.msk.f32.gmra.mrb[2].mxu0 %vm118_vm0, %v53_v14  ;;  %v995_v10 = vld [vmem:[%s1140_s3] sm:$0xff] }
  0x2b   :  { %734 = vmatpush1.bf16.msra.mxu0 %v733_v13  ;;  %690 = vmatmul.mubr.msk.f32.gmra.mrb[2].mxu1 %vm118_vm0, %v53_v14  ;;  %v1003_v13 = vld [vmem:[%s1140_s3 + $0x8] sm:$0xff] }
  0x2c   :  { %750 = vmatpush1.bf16.msra.mxu1 %v749_v15  ;;  %736 = vmatprep.subr.bf16.mxu0 %v735_v16 }
  0x2d   :  { %752 = vmatprep.subr.bf16.mxu1 %v751_v20  ;;  %343 = vmatprep.mubr.f32.mxu0 %v830_v0  ;;  %v1031_v20 = vadd.s32 256, %v955_v50 }
  0x2e   :  { %420 = vmatprep.mubr.f32.mxu1 %v830_v0 }
  0x2f   :  { %738 = vmatpush1.bf16.msra.mxu0 %v737_v26  ;;  %v1045_v26 = vadd.s32 640, %v955_v50 }
  0x30   :  { %754 = vmatpush1.bf16.msra.mxu1 %v753_v27  ;;  %740 = vmatprep.subr.bf16.mxu0 %v739_v28 }
  0x31   :  { %756 = vmatprep.subr.bf16.mxu1 %v755_v31 }
  0x33   :  { %742 = vmatpush1.bf16.msra.mxu0 %v741_v34 }
  0x34   :  { %758 = vmatpush1.bf16.msra.mxu1 %v757_v35 }
  0x36   :  { %691 = vmatmul.mubr.msk.f32.vlgmr.msra.gmra.mrb[4].mxu0 %vm118_vm0, %v880_v63 }
  0x37   :  { %693 = vmatmul.mubr.msk.f32.vlgmr.msra.gmra.mrb[4].mxu1 %vm118_vm0, %v880_v63  ;;  %349 = vmatprep.mubr.f32.mxu0 %v830_v0 }
  0x38   :  { %426 = vmatprep.mubr.f32.mxu1 %v830_v0 }
  0x3a   :  { %692 = vmatmul.mubr.msk.f32.gmra.mrb[6].mxu0 %vm118_vm0, %v53_v14 }
  0x3b   :  { %694 = vmatmul.mubr.msk.f32.gmra.mrb[6].mxu1 %vm118_vm0, %v53_v14 }
  0xf9   :  { %v931_v38 = vpop.f32.mrb[0].mxu0 }
  0xfa   :  { %v933_v39 = vpop.f32.mrb[0].mxu1  ;;  %v935_v40 = vpop.f32.mrb[1].mxu0 }
  0xfb   :  { %v495_v41 = vmax.f32 %v931_v38, %v933_v39  ;;  %v939_v42 = vpop.f32.mrb[1].mxu1 }
  0xfc   :  { %v496_v43 = vmax.f32 %v935_v40, %v939_v42 }
  0xfd   :  { %v943_v44 = vpop.f32.mrb[2].mxu0 }
  0xfe   :  { %v945_v46 = vpop.f32.mrb[2].mxu1  ;;  %v947_v0 = vpop.f32.mrb[3].mxu0 }
  0xff   :  { %v504_v47 = vmax.f32 %v943_v44, %v945_v46  ;;  %v951_v48 = vpop.f32.mrb[3].mxu1 }
 0x100   :  { %v505_v49 = vmax.f32 %v947_v0, %v951_v48 }
 0x109   :  { %v960_v52 = vpop.f32.mrb[4].mxu0 }
 0x10a   :  { %v497_v53 = vmax.f32 %v495_v41, %v960_v52  ;;  %v964_v54 = vpop.f32.mrb[4].mxu1  ;;  %v966_v55 = vpop.f32.mrb[5].mxu0 }
 0x10b   :  { %v498_v56 = vmax.f32 %v496_v43, %v966_v55  ;;  %v424_v57 = vpop.f32.mrb[5].mxu1 }
 0x10c   :  { %v971_v58 = vsel %vm460_vm2, %v424_v57, -inf  ;;  %v499_v59 = vmax.f32 %v497_v53, %v964_v54 }
 0x10d   :  { %v974_v60 = vpop.f32.mrb[6].mxu0  ;;  %v500_v61 = vmax.f32 %v498_v56, %v971_v58 }
 0x10e   :  { %v506_v62 = vmax.f32 %v504_v47, %v974_v60  ;;  %v978_v63 = vpop.f32.mrb[6].mxu1  ;;  %v980_v1 = vpop.f32.mrb[7].mxu0 }
 0x10f   :  { %v507_v2 = vmax.f32 %v505_v49, %v980_v1  ;;  %v430_v3 = vpop.f32.mrb[7].mxu1  ;;  %v501_v4 = vmax.f32 %v499_v59, %v500_v61 }
 0x110   :  { %v985_v5 = vsel %vm460_vm2, %v430_v3, -inf  ;;  %v508_v6 = vmax.f32 %v506_v62, %v978_v63 }
 0x111   :  { %v509_v7 = vmax.f32 %v507_v2, %v985_v5  ;;  %502 = vmax.xlane.f32.xlu0 %v501_v4 }
 0x113   :  { %v510_v8 = vmax.f32 %v508_v6, %v509_v7 }
 0x115   :  { %511 = vmax.xlane.f32.xlu0 %v510_v8 }
 0x12b   :  { %611 = vperm.xlu0 %766, %v608_v9  }
 0x19e   :  { %v503_v11 = vpop.xlane.xlu0 %502 }
 0x19f   :  { %v998_v12 = vmax.f32 %v995_v10, %v503_v11 }
 0x1a1   :  { %v593_v14 = vsub.f32 %v995_v10, %v998_v12  ;;  %606 = vst.msk [vmem:[%s1140_s3] sm:$0xff] %vm45_vm1, %v998_v12  ;;  %517 = vperm.xlu1 %765, %v998_v12   ;;  %v592_v10 = vld [vmem:[%s1141_s4 + $0x8] sm:$0xff] }
 0x1a2   :  { %v512_v15 = vpop.xlane.xlu0 %511 }
 0x1a3   :  { %v1014_v16 = vmax.f32 %v1003_v13, %v512_v15 }
 0x1a5   :  { %v594_v17 = vsub.f32 %v1003_v13, %v1014_v16  ;;  %607 = vst.msk [vmem:[%s1140_s3 + $0x8] sm:$0xff] %vm45_vm1, %v1014_v16  ;;  %522 = vperm.xlu1 %765, %v1014_v16   ;;  %v633_v16 = vld [vmem:[%s1142_s5 + $0x8] sm:$0xff] }
 0x1a9   :  { %614 = vperm.xlu1 %765, %v609_v18  }
 0x1aa   :  { %v612_v21 = vpop.permute.xlu0 %611 }
 0x1ab   :  { %vm616_vm3 = vcmp.eq.s32.totalorder %v955_v50, %v612_v21  ;;  %vm617_vm4 = vcmp.eq.s32.totalorder %v1028_v19, %v612_v21  ;;  %vm618_vm5 = vcmp.eq.s32.totalorder %v1031_v20, %v612_v21  ;;  %vm619_vm6 = vcmp.eq.s32.totalorder %v1034_v22, %v612_v21 }
 0x1ac   :  { %v634_v24 = vsel %vm616_vm3, %v931_v38, 0.0  ;;  %v635_v25 = vsel %vm617_vm4, %v935_v40, 0.0  ;;  %v636_v28 = vsel %vm618_vm5, %v933_v39, 0.0  ;;  %vm620_vm7 = vcmp.eq.s32.totalorder %v1039_v23, %v612_v21 }
 0x1ad   :  { %v650_v27 = vadd.f32 %v635_v25, %v634_v24  ;;  %v637_v31 = vsel %vm619_vm6, %v939_v42, 0.0  ;;  %vm621_vm8 = vcmp.eq.s32.totalorder %v1045_v26, %v612_v21  ;;  %v638_v33 = vsel %vm620_vm7, %v960_v52, 0.0 }
 0x1ae   :  { %vm622_vm9 = vcmp.eq.s32.totalorder %v1050_v29, %v612_v21  ;;  %v639_v35 = vsel %vm621_vm8, %v966_v55, 0.0  ;;  %vm623_vm10 = vcmp.eq.s32.totalorder %v958_v51, %v612_v21 }
 0x1af   :  { %v651_v30 = vadd.f32 %v650_v27, %v636_v28  ;;  %v640_v37 = vsel %vm622_vm9, %v964_v54, 0.0  ;;  %v641_v43 = vsel %vm623_vm10, %v971_v58, 0.0 }
 0x1b1   :  { %v652_v32 = vadd.f32 %v651_v30, %v637_v31 }
 0x1b3   :  { %v653_v34 = vadd.f32 %v652_v32, %v638_v33 }
 0x1b5   :  { %v654_v36 = vadd.f32 %v653_v34, %v639_v35 }
 0x1b7   :  { %v655_v41 = vadd.f32 %v654_v36, %v640_v37 }
 0x1b9   :  { %v656_v45 = vadd.f32 %v655_v41, %v641_v43 }
 0x1bb   :  { %657 = vadd.xlane.f32.xlu0 %v656_v45 }
 0x220   :  { %v518_v47 = vpop.permute.xlu1 %517 }
 0x221   :  { %v525_v49 = vsub.f32 %v931_v38, %v518_v47  ;;  %v526_v53 = vsub.f32 %v935_v40, %v518_v47  ;;  %v527_v56 = vsub.f32 %v933_v39, %v518_v47  ;;  %v528_v57 = vsub.f32 %v939_v42, %v518_v47 }
 0x222   :  { %v529_v4 = vsub.f32 %v960_v52, %v518_v47  ;;  %v530_v40 = vsub.f32 %v966_v55, %v518_v47  ;;  %v531_v39 = vsub.f32 %v964_v54, %v518_v47  ;;  %v532_v18 = vsub.f32 %v971_v58, %v518_v47 }
 0x223   :  { %v541_v59 = vmul.f32 1.442695, %v525_v49  ;;  %v543_v61 = vmul.f32 1.442695, %v526_v53  ;;  %v545_v62 = vmul.f32 1.442695, %v527_v56 }
 0x224   :  { %v547_v2 = vmul.f32 1.442695, %v528_v57  ;;  %v523_v3 = vpop.permute.xlu1 %522  ;;  %v549_v52 = vmul.f32 1.442695, %v529_v4  ;;  %v551_v21 = vmul.f32 1.442695, %v530_v40 }
 0x225   :  { %767 = vpow2.f32 %v541_v59  ;;  %v533_v6 = vsub.f32 %v943_v44, %v523_v3  ;;  %v534_v7 = vsub.f32 %v947_v0, %v523_v3  ;;  %v535_v38 = vsub.f32 %v945_v46, %v523_v3 }
 0x226   :  { %769 = vpow2.f32 %v543_v61  ;;  %v536_v11 = vsub.f32 %v951_v48, %v523_v3  ;;  %v537_v24 = vsub.f32 %v974_v60, %v523_v3  ;;  %v553_v54 = vmul.f32 1.442695, %v531_v39 }
 0x227   :  { %771 = vpow2.f32 %v545_v62  ;;  %v557_v42 = vmul.f32 1.442695, %v533_v6  ;;  %v559_v8 = vmul.f32 1.442695, %v534_v7  ;;  %v561_v9 = vmul.f32 1.442695, %v535_v38 }
 0x228   :  { %v1072_v15 = vpop.permute.xlu1 %614  ;;  %773 = vpow2.f32 %v547_v2  ;;  %v563_v55 = vmul.f32 1.442695, %v536_v11  ;;  %v538_v25 = vsub.f32 %v980_v1, %v523_v3  ;;  %v555_v27 = vmul.f32 1.442695, %v532_v18 }
 0x229   :  { %775 = vpow2.f32 %v557_v42  ;;  %vm624_vm11 = vcmp.eq.s32.totalorder %v955_v50, %v1072_v15  ;;  %vm625_vm12 = vcmp.eq.s32.totalorder %v1028_v19, %v1072_v15  ;;  %v539_v28 = vsub.f32 %v978_v63, %v523_v3 }
 0x22a   :  { %777 = vpow2.f32 %v559_v8  ;;  %v642_v58 = vsel %vm624_vm11, %v943_v44, 0.0  ;;  %v565_v30 = vmul.f32 1.442695, %v537_v24  ;;  %vm626_vm13 = vcmp.eq.s32.totalorder %v1031_v20, %v1072_v15 }
 0x22b   :  { %779 = vpow2.f32 %v561_v9  ;;  %v643_v50 = vsel %vm625_vm12, %v947_v0, 0.0  ;;  %v540_v19 = vsub.f32 %v985_v5, %v523_v3  ;;  %v567_v33 = vmul.f32 1.442695, %v538_v25 }
 0x22c   :  { %781 = vpow2.f32 %v549_v52  ;;  %vm627_vm14 = vcmp.eq.s32.totalorder %v1034_v22, %v1072_v15  ;;  %v659_v34 = vadd.f32 %v643_v50, %v642_v58  ;;  %v644_v36 = vsel %vm626_vm13, %v945_v46, 0.0 }
 0x22d   :  { %783 = vpow2.f32 %v551_v21  ;;  %v569_v20 = vmul.f32 1.442695, %v539_v28  ;;  %vm628_vm15 = vcmp.eq.s32.totalorder %v1039_v23, %v1072_v15  ;;  %v645_v45 = vsel %vm627_vm14, %v951_v48, 0.0 }
 0x22e   :  { %785 = vpow2.f32 %v553_v54  ;;  %v660_v0 = vadd.f32 %v659_v34, %v644_v36  ;;  %v571_v22 = vmul.f32 1.442695, %v540_v19  ;;  %vm629_vm0 = vcmp.eq.s32.totalorder %v1045_v26, %v1072_v15  ;;  %v632_v54 = vld [vmem:[%s1142_s5] sm:$0xff] }
 0x22f   :  { %v768_v31 = vpop.eup %767  ;;  %787 = vpow2.f32 %v563_v55  ;;  %v646_v57 = vsel %vm628_vm15, %v974_v60, 0.0  ;;  %vm630_vm2 = vcmp.eq.s32.totalorder %v1050_v29, %v1072_v15  ;;  %v647_v62 = vsel %vm629_vm0, %v980_v1, 0.0 }
 0x230   :  { %v770_v32 = vpop.eup %769  ;;  %789 = vpow2.f32 %v555_v27  ;;  %v661_v49 = vadd.f32 %v660_v0, %v645_v45  ;;  %v648_v6 = vsel %vm630_vm2, %v978_v63, 0.0  ;;  %vm631_vm3 = vcmp.eq.s32.totalorder %v958_v51, %v1072_v15  ;;  %v591_v27 = vld [vmem:[%s1141_s4] sm:$0xff] }
 0x231   :  { %v772_v35 = vpop.eup %771  ;;  %v573_v44 = vadd.f32 %v770_v32, %v768_v31  ;;  %791 = vpow2.f32 %v565_v30  ;;  %v649_v63 = vsel %vm631_vm3, %v985_v5, 0.0  ;;  %v595_v51 = vmul.f32 1.442695, %v593_v14 }
 0x232   :  { %v774_v37 = vpop.eup %773  ;;  %793 = vpow2.f32 %v567_v33  ;;  %v662_v23 = vadd.f32 %v661_v49, %v646_v57  ;;  %v597_v5 = vmul.f32 1.442695, %v594_v17 }
 0x233   :  { %v776_v41 = vpop.eup %775  ;;  %v574_v43 = vadd.f32 %v772_v35, %v573_v44  ;;  %795 = vpow2.f32 %v569_v20 }
 0x234   :  { %v778_v47 = vpop.eup %777  ;;  %797 = vpow2.f32 %v571_v22  ;;  %v663_v3 = vadd.f32 %v662_v23, %v647_v62 }
 0x235   :  { %v780_v53 = vpop.eup %779  ;;  %v575_v46 = vadd.f32 %v774_v37, %v574_v43  ;;  %v582_v56 = vadd.f32 %v778_v47, %v776_v41  ;;  %799 = vpow2.f32 %v595_v51 }
 0x236   :  { %v782_v59 = vpop.eup %781  ;;  %v664_v38 = vadd.f32 %v663_v3, %v648_v6  ;;  %801 = vpow2.f32 %v597_v5 }
 0x237   :  { %v576_v61 = vadd.f32 %v782_v59, %v575_v46  ;;  %v583_v48 = vadd.f32 %v780_v53, %v582_v56  ;;  %v784_v2 = vpop.eup %783 }
 0x238   :  { %v786_v26 = vpop.eup %785  ;;  %v665_v24 = vadd.f32 %v664_v38, %v649_v63 }
 0x239   :  { %v577_v4 = vadd.f32 %v784_v2, %v576_v61  ;;  %v788_v7 = vpop.eup %787 }
 0x23a   :  { %v790_v60 = vpop.eup %789  ;;  %v584_v39 = vadd.f32 %v788_v7, %v583_v48 }
 0x23b   :  { %v578_v40 = vadd.f32 %v786_v26, %v577_v4  ;;  %v792_v42 = vpop.eup %791 }
 0x23c   :  { %v585_v29 = vadd.f32 %v792_v42, %v584_v39  ;;  %v794_v9 = vpop.eup %793 }
 0x23d   :  { %v579_v8 = vadd.f32 %v790_v60, %v578_v40  ;;  %v796_v52 = vpop.eup %795 }
 0x23e   :  { %v586_v11 = vadd.f32 %v794_v9, %v585_v29  ;;  %v798_v18 = vpop.eup %797 }
 0x23f   :  { %580 = vadd.xlane.f32.xlu1 %v579_v8  ;;  %v800_v15 = vpop.eup %799 }
 0x240   :  { %v587_v1 = vadd.f32 %v796_v52, %v586_v11  ;;  %v599_v28 = vmul.f32 %v800_v15, %v591_v27  ;;  %v802_v50 = vpop.eup %801 }
 0x241   :  { %v600_v12 = vmul.f32 %v802_v50, %v592_v10 }
 0x242   :  { %v588_v21 = vadd.f32 %v798_v18, %v587_v1 }
 0x244   :  { %589 = vadd.xlane.f32.xlu1 %v588_v21 }
 0x248   :  { %666 = vadd.xlane.f32.xlu1 %v665_v24  ;;  %v658_v55 = vpop.xlane.xlu0 %657 }
 0x249   :  { %v668_v25 = vadd.f32 %v658_v55, %v632_v54 }
 0x24b   :  { %670 = vst.msk [vmem:[%s1142_s5] sm:$0xff] %vm45_vm1, %v668_v25 }
 0x2cc   :  { %v581_v58 = vpop.xlane.xlu1 %580 }
 0x2cd   :  { %v601_v30 = vadd.f32 %v599_v28, %v581_v58 }
 0x2cf   :  { %604 = vst.msk [vmem:[%s1141_s4] sm:$0xff] %vm45_vm1, %v601_v30 }
 0x2d1   :  { %v590_v13 = vpop.xlane.xlu1 %589 }
 0x2d2   :  { %v602_v14 = vadd.f32 %v600_v12, %v590_v13 }
 0x2d4   :  { %605 = vst.msk [vmem:[%s1141_s4 + $0x8] sm:$0xff] %vm45_vm1, %v602_v14 }
 0x2d5   :  { %v667_v17 = vpop.xlane.xlu1 %666 }
 0x2d6   :  { %v669_v31 = vadd.f32 %v667_v17, %v633_v16 }
 0x2d8   :  { %671 = vst.msk [vmem:[%s1142_s5 + $0x8] sm:$0xff] %vm45_vm1, %v669_v31 }
 0x2d9   :  { %684 = vsyncpa [#allocation3], 1 }

</bundles_post_ra>
